<compile_context>
chip_gen: v7x
topology: tpu7x:2x2x1
jax: 0.10.0
libtpu: 0.0.40
codegen_flags: <defaults>
</compile_context>

<pallas_src>
import jax
import jax.numpy as jnp
from jax.experimental import pallas as pl
from jax.experimental.pallas import tpu as pltpu

# Small problem sizes consistent with the module.
B = 2          # batch
H = W = 16     # spatial
C0 = 4         # channel[0]
C1 = 8         # channel[1]


def resblk_kernel(xcat_ref, w1_ref, b1_ref, xc_ref, wb_ref, bb_ref,
                  ss_ref, w2_ref, b2_ref, out_ref):
    """Single grid step; everything lane-dense, all contractions on the MXU.

    xcat_ref : (B*H, 3*W*C0)   H-shifted input slabs concatenated along K
    w1_ref   : (3*W*C0, W*C1)  banded conv1 weights (3x3, pad=1 folded in)
    b1_ref   : (1, W*C1)       conv1 bias tiled across W
    xc_ref   : (B*H, W*C0)     unshifted input (bypass)
    wb_ref   : (W*C0, W*C1)    kron(I_W, Wb) 1x1 bypass weights
    bb_ref   : (1, W*C1)       bypass bias tiled across W
    ss_ref   : (3, B*H, B*H)   block-diagonal H row-shift matrices
    w2_ref   : (3, W*C1, W*C1) banded conv2 weights, one per H tap
    b2_ref   : (1, W*C1)       conv2 bias tiled across W
    out_ref  : (B*H, W*C1)
    """
    f32 = jnp.float32

    # conv1 (3x3, pad=1) + bias + ReLU: a single MXU matmul over K = 3*W*C0.
    y1 = jnp.maximum(
        jnp.dot(xcat_ref[...], w1_ref[...], preferred_element_type=f32)
        + b1_ref[...],
        0.0)                                                    # (B*H, W*C1)

    # bypass (1x1 conv) + both remaining biases folded into the accumulator.
    acc = (jnp.dot(xc_ref[...], wb_ref[...], preferred_element_type=f32)
           + bb_ref[...] + b2_ref[...])                          # (B*H, W*C1)

    # conv2 (3x3, pad=1): 3 H taps; each = row-shift matmul + banded matmul.
    for dy in range(3):
        shifted = jnp.dot(ss_ref[dy], y1, preferred_element_type=f32)
        acc = acc + jnp.dot(shifted, w2_ref[dy], preferred_element_type=f32)

    out_ref[...] = acc.astype(out_ref.dtype)


# ------------------------- wrapper-side operand prep --------------------------
def _band_weights(w_taps, cin, cout, width):
    """w_taps: (3, cin, cout) taps along W -> (width*cin, width*cout) band.

    band[w_in*cin+ci, w_out*cout+co] = w_taps[w_in - w_out + 1, ci, co]
    (zero outside the band, which implements zero padding along W).
    """
    blk = jnp.zeros((width, cin, width, cout), jnp.float32)
    for dx in range(3):
        sel = jnp.eye(width, k=1 - dx, dtype=jnp.float32)  # [w_in == w_out + dx - 1]
        blk = blk + sel[:, None, :, None] * w_taps[dx][None, :, None, :]
    return blk.reshape(width * cin, width * cout)


def _prepare_operands(x_nchw, params):
    w1, b1, w2, b2, wb, bb = params
    x = jnp.transpose(x_nchw, (0, 2, 3, 1)).astype(jnp.float32)   # NHWC (B,H,W,C0)

    # H-shifted, lane-dense input slabs for conv1 (pad H only; W pad is in the band).
    xpad_h = jnp.pad(x, ((0, 0), (1, 1), (0, 0), (0, 0)))         # (B, H+2, W, C0)
    xcat = jnp.concatenate(
        [xpad_h[:, dy:dy + H].reshape(B * H, W * C0) for dy in range(3)], axis=1)
    xc = x.reshape(B * H, W * C0)                                 # bypass input

    # Banded weights.
    w1_cat = jnp.concatenate(
        [_band_weights(w1[dy], C0, C1, W) for dy in range(3)], axis=0)   # (192, 128)
    w2_band = jnp.stack(
        [_band_weights(w2[dy], C1, C1, W) for dy in range(3)], axis=0)   # (3, 128, 128)
    wb_kron = jnp.kron(jnp.eye(W, dtype=jnp.float32), wb)                # (64, 128)

    # Block-diagonal H row-shift matrices (zero pad in H, no batch mixing).
    ss = jnp.stack([jnp.kron(jnp.eye(B, dtype=jnp.float32),
                             jnp.eye(H, k=dy - 1, dtype=jnp.float32))
                    for dy in range(3)], axis=0)                         # (3, 32, 32)

    # Biases tiled across W so they broadcast over the (B*H, W*C1) layout.
    b1_row = jnp.tile(b1.reshape(1, C1), (1, W))
    b2_row = jnp.tile(b2.reshape(1, C1), (1, W))
    bb_row = jnp.tile(bb.reshape(1, C1), (1, W))
    return xcat, w1_cat, b1_row, xc, wb_kron, bb_row, ss, w2_band, b2_row


@jax.jit
def resblk_forward(x_nchw, params):
    """x_nchw: (B, C0, H, W) -> (B, C1, H, W), matching the PyTorch module."""
    ops = _prepare_operands(x_nchw, params)

    out2d = pl.pallas_call(
        resblk_kernel,
        out_shape=jax.ShapeDtypeStruct((B * H, W * C1), jnp.float32),
        grid_spec=pltpu.PrefetchScalarGridSpec(
            num_scalar_prefetch=0,
            grid=(1,),                                   # whole problem in one step
            in_specs=[
                pl.BlockSpec((B * H, 3 * W * C0), lambda i: (0, 0)),
                pl.BlockSpec((3 * W * C0, W * C1), lambda i: (0, 0)),
                pl.BlockSpec((1, W * C1), lambda i: (0, 0)),
                pl.BlockSpec((B * H, W * C0), lambda i: (0, 0)),
                pl.BlockSpec((W * C0, W * C1), lambda i: (0, 0)),
                pl.BlockSpec((1, W * C1), lambda i: (0, 0)),
                pl.BlockSpec((3, B * H, B * H), lambda i: (0, 0, 0)),
                pl.BlockSpec((3, W * C1, W * C1), lambda i: (0, 0, 0)),
                pl.BlockSpec((1, W * C1), lambda i: (0, 0)),
            ],
            out_specs=pl.BlockSpec((B * H, W * C1), lambda i: (0, 0)),
        ),
        compiler_params=pltpu.CompilerParams(dimension_semantics=("arbitrary",)),
    )(*ops)

    # (B*H, W*C1) -> (B, H, W, C1) -> NCHW
    return jnp.transpose(out2d.reshape(B, H, W, C1), (0, 3, 1, 2))


# -------------------------- pure-JAX reference --------------------------------
def _conv_ref(x_nhwc, w_hwio, b, pad):
    y = jax.lax.conv_general_dilated(
        x_nhwc, w_hwio, window_strides=(1, 1),
        padding=[(pad, pad), (pad, pad)],
        dimension_numbers=("NHWC", "HWIO", "NHWC"))
    return y + b.reshape(1, 1, 1, -1)


def resblk_reference(x_nchw, params):
    w1, b1, w2, b2, wb, bb = params
    x = jnp.transpose(x_nchw, (0, 2, 3, 1))
    y1 = jnp.maximum(_conv_ref(x, w1, b1, 1), 0.0)
    y2 = _conv_ref(y1, w2, b2, 1)
    bp = _conv_ref(x, wb.reshape(1, 1, C0, C1), bb, 0)
    return jnp.transpose(y2 + bp, (0, 3, 1, 2))


if __name__ == "__main__":
    key = jax.random.PRNGKey(0)
    ks = jax.random.split(key, 7)

    x = jax.random.normal(ks[0], (B, C0, H, W), jnp.float32)

    # Deterministic synthetic parameters (shapes implied by the module).
    w1 = jax.random.normal(ks[1], (3, 3, C0, C1), jnp.float32) * 0.1
    b1 = jax.random.normal(ks[2], (1, C1), jnp.float32) * 0.1
    w2 = jax.random.normal(ks[3], (3, 3, C1, C1), jnp.float32) * 0.1
    b2 = jax.random.normal(ks[4], (1, C1), jnp.float32) * 0.1
    wb = jax.random.normal(ks[5], (C0, C1), jnp.float32) * 0.1
    bb = jax.random.normal(ks[6], (1, C1), jnp.float32) * 0.1
    params = (w1, b1, w2, b2, wb, bb)

    out = resblk_forward(x, params)
    out = jax.block_until_ready(out)

    ref = resblk_reference(x, params)
    assert out.shape == (B, C1, H, W)
    assert jnp.allclose(out, ref, atol=1e-4, rtol=1e-4), "mismatch vs reference"

    print("KERNEL_OK")
</pallas_src>

<mosaic_0001>
module attributes {stable_mosaic.version = 11 : i64} {
  func.func @resblk_kernel(%arg0: i32, %arg1: memref<32x192xf32, #tpu.memory_space<vmem>>, %arg2: memref<192x128xf32, #tpu.memory_space<vmem>>, %arg3: memref<1x128xf32, #tpu.memory_space<vmem>>, %arg4: memref<32x64xf32, #tpu.memory_space<vmem>>, %arg5: memref<64x128xf32, #tpu.memory_space<vmem>>, %arg6: memref<1x128xf32, #tpu.memory_space<vmem>>, %arg7: memref<3x32x32xf32, #tpu.memory_space<vmem>>, %arg8: memref<3x128x128xf32, #tpu.memory_space<vmem>>, %arg9: memref<1x128xf32, #tpu.memory_space<vmem>>, %arg10: memref<32x128xf32, #tpu.memory_space<vmem>>) attributes {dimension_semantics = [#tpu.dimension_semantics<arbitrary>], iteration_bounds = array<i64: 1>, scalar_prefetch = 0 : i64, scratch_operands = 0 : i64, tpu.core_type = #tpu.core_type<tc>, window_params = [{pipeline_mode = #tpu.pipeline_mode<synchronous>, transform_indices = @transform_0, window_bounds = array<i64: 32, 192>}, {pipeline_mode = #tpu.pipeline_mode<synchronous>, transform_indices = @transform_1, window_bounds = array<i64: 192, 128>}, {pipeline_mode = #tpu.pipeline_mode<synchronous>, transform_indices = @transform_2, window_bounds = array<i64: 1, 128>}, {pipeline_mode = #tpu.pipeline_mode<synchronous>, transform_indices = @transform_3, window_bounds = array<i64: 32, 64>}, {pipeline_mode = #tpu.pipeline_mode<synchronous>, transform_indices = @transform_4, window_bounds = array<i64: 64, 128>}, {pipeline_mode = #tpu.pipeline_mode<synchronous>, transform_indices = @transform_5, window_bounds = array<i64: 1, 128>}, {pipeline_mode = #tpu.pipeline_mode<synchronous>, transform_indices = @transform_6, window_bounds = array<i64: 3, 32, 32>}, {pipeline_mode = #tpu.pipeline_mode<synchronous>, transform_indices = @transform_7, window_bounds = array<i64: 3, 128, 128>}, {pipeline_mode = #tpu.pipeline_mode<synchronous>, transform_indices = @transform_8, window_bounds = array<i64: 1, 128>}, {pipeline_mode = #tpu.pipeline_mode<synchronous>, transform_indices = @transform_9, window_bounds = array<i64: 32, 128>}]} {
    %c0 = arith.constant 0 : index
    %c0_0 = arith.constant 0 : index
    %0 = vector.load %arg1[%c0, %c0_0] : memref<32x192xf32, #tpu.memory_space<vmem>>, vector<32x192xf32>
    %c0_1 = arith.constant 0 : index
    %c0_2 = arith.constant 0 : index
    %1 = vector.load %arg2[%c0_1, %c0_2] : memref<192x128xf32, #tpu.memory_space<vmem>>, vector<192x128xf32>
    %cst = arith.constant dense<0.000000e+00> : vector<32x128xf32>
    %2 = tpu.matmul %0, %1, %cst {dimension_numbers = #tpu.dot_dimension_numbers<[1], [0], [0], [1], [0, 0, 1, 1], [], []>} : vector<32x192xf32>, vector<192x128xf32>, vector<32x128xf32> -> vector<32x128xf32>
    %c0_3 = arith.constant 0 : index
    %c0_4 = arith.constant 0 : index
    %3 = vector.load %arg3[%c0_3, %c0_4] : memref<1x128xf32, #tpu.memory_space<vmem>>, vector<1x128xf32>
    %4 = vector.broadcast %3 : vector<1x128xf32> to vector<32x128xf32>
    %5 = arith.addf %2, %4 : vector<32x128xf32>
    %cst_5 = arith.constant 0.000000e+00 : f32
    %6 = vector.broadcast %cst_5 : f32 to vector<32x128xf32>
    %7 = arith.maximumf %5, %6 : vector<32x128xf32>
    %c0_6 = arith.constant 0 : index
    %c0_7 = arith.constant 0 : index
    %8 = vector.load %arg4[%c0_6, %c0_7] : memref<32x64xf32, #tpu.memory_space<vmem>>, vector<32x64xf32>
    %c0_8 = arith.constant 0 : index
    %c0_9 = arith.constant 0 : index
    %9 = vector.load %arg5[%c0_8, %c0_9] : memref<64x128xf32, #tpu.memory_space<vmem>>, vector<64x128xf32>
    %cst_10 = arith.constant dense<0.000000e+00> : vector<32x128xf32>
    %10 = tpu.matmul %8, %9, %cst_10 {dimension_numbers = #tpu.dot_dimension_numbers<[1], [0], [0], [1], [0, 0, 1, 1], [], []>} : vector<32x64xf32>, vector<64x128xf32>, vector<32x128xf32> -> vector<32x128xf32>
    %c0_11 = arith.constant 0 : index
    %c0_12 = arith.constant 0 : index
    %11 = vector.load %arg6[%c0_11, %c0_12] : memref<1x128xf32, #tpu.memory_space<vmem>>, vector<1x128xf32>
    %12 = vector.broadcast %11 : vector<1x128xf32> to vector<32x128xf32>
    %13 = arith.addf %10, %12 : vector<32x128xf32>
    %c0_13 = arith.constant 0 : index
    %c0_14 = arith.constant 0 : index
    %14 = vector.load %arg9[%c0_13, %c0_14] : memref<1x128xf32, #tpu.memory_space<vmem>>, vector<1x128xf32>
    %15 = vector.broadcast %14 : vector<1x128xf32> to vector<32x128xf32>
    %16 = arith.addf %13, %15 : vector<32x128xf32>
    %c0_15 = arith.constant 0 : index
    %c0_16 = arith.constant 0 : index
    %c0_17 = arith.constant 0 : index
    %17 = vector.load %arg7[%c0_15, %c0_16, %c0_17] : memref<3x32x32xf32, #tpu.memory_space<vmem>>, vector<1x32x32xf32>
    %18 = vector.shape_cast %17 : vector<1x32x32xf32> to vector<32x32xf32>
    %cst_18 = arith.constant dense<0.000000e+00> : vector<32x128xf32>
    %19 = tpu.matmul %18, %7, %cst_18 {dimension_numbers = #tpu.dot_dimension_numbers<[1], [0], [0], [1], [0, 0, 1, 1], [], []>} : vector<32x32xf32>, vector<32x128xf32>, vector<32x128xf32> -> vector<32x128xf32>
    %c0_19 = arith.constant 0 : index
    %c0_20 = arith.constant 0 : index
    %c0_21 = arith.constant 0 : index
    %20 = vector.load %arg8[%c0_19, %c0_20, %c0_21] : memref<3x128x128xf32, #tpu.memory_space<vmem>>, vector<1x128x128xf32>
    %21 = vector.shape_cast %20 : vector<1x128x128xf32> to vector<128x128xf32>
    %cst_22 = arith.constant dense<0.000000e+00> : vector<32x128xf32>
    %22 = tpu.matmul %19, %21, %cst_22 {dimension_numbers = #tpu.dot_dimension_numbers<[1], [0], [0], [1], [0, 0, 1, 1], [], []>} : vector<32x128xf32>, vector<128x128xf32>, vector<32x128xf32> -> vector<32x128xf32>
    %23 = arith.addf %16, %22 : vector<32x128xf32>
    %c1 = arith.constant 1 : index
    %c0_23 = arith.constant 0 : index
    %c0_24 = arith.constant 0 : index
    %24 = vector.load %arg7[%c1, %c0_23, %c0_24] : memref<3x32x32xf32, #tpu.memory_space<vmem>>, vector<1x32x32xf32>
    %25 = vector.shape_cast %24 : vector<1x32x32xf32> to vector<32x32xf32>
    %cst_25 = arith.constant dense<0.000000e+00> : vector<32x128xf32>
    %26 = tpu.matmul %25, %7, %cst_25 {dimension_numbers = #tpu.dot_dimension_numbers<[1], [0], [0], [1], [0, 0, 1, 1], [], []>} : vector<32x32xf32>, vector<32x128xf32>, vector<32x128xf32> -> vector<32x128xf32>
    %c1_26 = arith.constant 1 : index
    %c0_27 = arith.constant 0 : index
    %c0_28 = arith.constant 0 : index
    %27 = vector.load %arg8[%c1_26, %c0_27, %c0_28] : memref<3x128x128xf32, #tpu.memory_space<vmem>>, vector<1x128x128xf32>
    %28 = vector.shape_cast %27 : vector<1x128x128xf32> to vector<128x128xf32>
    %cst_29 = arith.constant dense<0.000000e+00> : vector<32x128xf32>
    %29 = tpu.matmul %26, %28, %cst_29 {dimension_numbers = #tpu.dot_dimension_numbers<[1], [0], [0], [1], [0, 0, 1, 1], [], []>} : vector<32x128xf32>, vector<128x128xf32>, vector<32x128xf32> -> vector<32x128xf32>
    %30 = arith.addf %23, %29 : vector<32x128xf32>
    %c2 = arith.constant 2 : index
    %c0_30 = arith.constant 0 : index
    %c0_31 = arith.constant 0 : index
    %31 = vector.load %arg7[%c2, %c0_30, %c0_31] : memref<3x32x32xf32, #tpu.memory_space<vmem>>, vector<1x32x32xf32>
    %32 = vector.shape_cast %31 : vector<1x32x32xf32> to vector<32x32xf32>
    %cst_32 = arith.constant dense<0.000000e+00> : vector<32x128xf32>
    %33 = tpu.matmul %32, %7, %cst_32 {dimension_numbers = #tpu.dot_dimension_numbers<[1], [0], [0], [1], [0, 0, 1, 1], [], []>} : vector<32x32xf32>, vector<32x128xf32>, vector<32x128xf32> -> vector<32x128xf32>
    %c2_33 = arith.constant 2 : index
    %c0_34 = arith.constant 0 : index
    %c0_35 = arith.constant 0 : index
    %34 = vector.load %arg8[%c2_33, %c0_34, %c0_35] : memref<3x128x128xf32, #tpu.memory_space<vmem>>, vector<1x128x128xf32>
    %35 = vector.shape_cast %34 : vector<1x128x128xf32> to vector<128x128xf32>
    %cst_36 = arith.constant dense<0.000000e+00> : vector<32x128xf32>
    %36 = tpu.matmul %33, %35, %cst_36 {dimension_numbers = #tpu.dot_dimension_numbers<[1], [0], [0], [1], [0, 0, 1, 1], [], []>} : vector<32x128xf32>, vector<128x128xf32>, vector<32x128xf32> -> vector<32x128xf32>
    %37 = arith.addf %30, %36 : vector<32x128xf32>
    %c0_37 = arith.constant 0 : index
    %c0_38 = arith.constant 0 : index
    %38 = vector.load %arg10[%c0_37, %c0_38] : memref<32x128xf32, #tpu.memory_space<vmem>>, vector<32x128xf32>
    tpu.vector_store %arg10[%c0_37, %c0_38], %37 {strides = array<i32>} : memref<32x128xf32, #tpu.memory_space<vmem>>, vector<32x128xf32>,
    return
  }
  func.func @transform_0(%arg0: i32) -> (i32, i32) {
    %c0_i32 = arith.constant 0 : i32
    %c0_i32_0 = arith.constant 0 : i32
    %c0_i32_1 = arith.constant 0 : i32
    return %c0_i32, %c0_i32_0 : i32, i32
  }
  func.func @transform_1(%arg0: i32) -> (i32, i32) {
    %c0_i32 = arith.constant 0 : i32
    %c0_i32_0 = arith.constant 0 : i32
    %c0_i32_1 = arith.constant 0 : i32
    return %c0_i32, %c0_i32_0 : i32, i32
  }
  func.func @transform_2(%arg0: i32) -> (i32, i32) {
    %c0_i32 = arith.constant 0 : i32
    %c0_i32_0 = arith.constant 0 : i32
    %c0_i32_1 = arith.constant 0 : i32
    return %c0_i32, %c0_i32_0 : i32, i32
  }
  func.func @transform_3(%arg0: i32) -> (i32, i32) {
    %c0_i32 = arith.constant 0 : i32
    %c0_i32_0 = arith.constant 0 : i32
    %c0_i32_1 = arith.constant 0 : i32
    return %c0_i32, %c0_i32_0 : i32, i32
  }
  func.func @transform_4(%arg0: i32) -> (i32, i32) {
    %c0_i32 = arith.constant 0 : i32
    %c0_i32_0 = arith.constant 0 : i32
    %c0_i32_1 = arith.constant 0 : i32
    return %c0_i32, %c0_i32_0 : i32, i32
  }
  func.func @transform_5(%arg0: i32) -> (i32, i32) {
    %c0_i32 = arith.constant 0 : i32
    %c0_i32_0 = arith.constant 0 : i32
    %c0_i32_1 = arith.constant 0 : i32
    return %c0_i32, %c0_i32_0 : i32, i32
  }
  func.func @transform_6(%arg0: i32) -> (i32, i32, i32) {
    %c0_i32 = arith.constant 0 : i32
    %c0_i32_0 = arith.constant 0 : i32
    %c0_i32_1 = arith.constant 0 : i32
    %c0_i32_2 = arith.constant 0 : i32
    return %c0_i32, %c0_i32_0, %c0_i32_1 : i32, i32, i32
  }
  func.func @transform_7(%arg0: i32) -> (i32, i32, i32) {
    %c0_i32 = arith.constant 0 : i32
    %c0_i32_0 = arith.constant 0 : i32
    %c0_i32_1 = arith.constant 0 : i32
    %c0_i32_2 = arith.constant 0 : i32
    return %c0_i32, %c0_i32_0, %c0_i32_1 : i32, i32, i32
  }
  func.func @transform_8(%arg0: i32) -> (i32, i32) {
    %c0_i32 = arith.constant 0 : i32
    %c0_i32_0 = arith.constant 0 : i32
    %c0_i32_1 = arith.constant 0 : i32
    return %c0_i32, %c0_i32_0 : i32, i32
  }
  func.func @transform_9(%arg0: i32) -> (i32, i32) {
    %c0_i32 = arith.constant 0 : i32
    %c0_i32_0 = arith.constant 0 : i32
    %c0_i32_1 = arith.constant 0 : i32
    return %c0_i32, %c0_i32_0 : i32, i32
  }
}

</mosaic_0001>

<bundles_post_ra>
// kernel: resblk_forward.1
= control target key start
LH: loop header
LB: loop body
LE: loop exit
PB: predicated region body
PF: predicated region fallthrough
CT: control target
= control target key end

     0   :  { %v1461_v0 = vmov 0.0|0.0   ;;  %vm71_vm0 = vcmask 523264   ;;  %vm304_vm1 = vcmask 261120   ;;  %s1917_s1 = inlined_call_operand.vmem [shape: f32[192,128], index: 1, kind: input, shape index: {}]   ;;  %s1918_s0 = inlined_call_operand.vmem [shape: f32[32,192], index: 0, kind: input, shape index: {}]   ;;  %s1919_s4 = inlined_call_operand.vmem [shape: f32[64,128], index: 4, kind: input, shape index: {}]   ;;  %s1920_s7 = inlined_call_operand.vmem [shape: f32[3,128,128], index: 7, kind: input, shape index: {}]   ;;  %s1921_s3 = inlined_call_operand.vmem [shape: f32[32,64], index: 3, kind: input, shape index: {}]   ;;  %s1922_s6 = inlined_call_operand.vmem [shape: f32[3,32,32], index: 6, kind: input, shape index: {}]   ;;  %s1923_s2 = inlined_call_operand.vmem [shape: f32[1,128], index: 2, kind: input, shape index: {}]   ;;  %s1924_s5 = inlined_call_operand.vmem [shape: f32[1,128], index: 5, kind: input, shape index: {}]   ;;  %s1925_s8 = inlined_call_operand.vmem [shape: f32[1,128], index: 8, kind: input, shape index: {}]   ;;  %s1926_s9 = inlined_call_operand.vmem [shape: f32[32,128], index: 9, kind: output, shape index: {}]  }
   0x1   :  { %1268 = vmatprep.subr.bf16.mxu0 %v1461_v0  ;;  %v40_v1 = vld [vmem:[%s1917_s1] sm:$0xff]  ;;  %v41_v2 = vld [vmem:[%s1917_s1 + $0x8] sm:$0xff]  ;;  %v42_v3 = vld [vmem:[%s1917_s1 + $0x10] sm:$0xff] }
   0x2   :  { %v1269_v4 = vpack.c.bf16 %v41_v2, %v40_v1  ;;  %v43_v5 = vld [vmem:[%s1917_s1 + $0x18] sm:$0xff]  ;;  %v44_v7 = vld [vmem:[%s1917_s1 + $0x20] sm:$0xff]  ;;  %v45_v8 = vld [vmem:[%s1917_s1 + $0x28] sm:$0xff] }
   0x3   :  { %v1272_v6 = vpack.c.bf16 %v43_v5, %v42_v3  ;;  %v1275_v9 = vpack.c.bf16 %v45_v8, %v44_v7  ;;  %v46_v10 = vld [vmem:[%s1917_s1 + $0x30] sm:$0xff]  ;;  %v47_v11 = vld [vmem:[%s1917_s1 + $0x38] sm:$0xff]  ;;  %v33_v12 = vld [vmem:[%s1918_s0 + $0x8] sm:$0xff] }
   0x4   :  { %1270 = vmatpush1.bf16.msra.mxu0 %v1269_v4  ;;  %932 = vmatprep.mubr.msk.f32.mxu0 %vm71_vm0, %v33_v12  ;;  %v1278_v13 = vpack.c.bf16 %v47_v11, %v46_v10  ;;  %v48_v14 = vld [vmem:[%s1917_s1 + $0x40] sm:$0xff]  ;;  %v49_v15 = vld [vmem:[%s1917_s1 + $0x48] sm:$0xff]  ;;  %v179_v19 = vld [vmem:[%s1919_s4 + $0x10] sm:$0xff] }
   0x5   :  { %1271 = vmatprep.subr.bf16.mxu0 %v1461_v0  ;;  %v177_v16 = vld [vmem:[%s1919_s4] sm:$0xff]  ;;  %v178_v17 = vld [vmem:[%s1919_s4 + $0x8] sm:$0xff]  ;;  %v1281_v20 = vpack.c.bf16 %v49_v15, %v48_v14  ;;  %v180_v21 = vld [vmem:[%s1919_s4 + $0x18] sm:$0xff] }
   0x6   :  { %v1304_v18 = vpack.c.bf16 %v178_v17, %v177_v16  ;;  %v50_v22 = vld [vmem:[%s1917_s1 + $0x50] sm:$0xff]  ;;  %v51_v23 = vld [vmem:[%s1917_s1 + $0x58] sm:$0xff]  ;;  %v1308_v24 = vpack.c.bf16 %v180_v21, %v179_v19  ;;  %v52_v26 = vld [vmem:[%s1917_s1 + $0x60] sm:$0xff] }
   0x7   :  { %v1284_v25 = vpack.c.bf16 %v51_v23, %v50_v22  ;;  %v53_v27 = vld [vmem:[%s1917_s1 + $0x68] sm:$0xff]  ;;  %v54_v29 = vld [vmem:[%s1917_s1 + $0x70] sm:$0xff]  ;;  %v55_v30 = vld [vmem:[%s1917_s1 + $0x78] sm:$0xff] }
   0x8   :  { %1273 = vmatpush1.bf16.msra.mxu0 %v1272_v6  ;;  %1305 = vmatprep.subr.bf16.mxu1 %v1304_v18  ;;  %v1287_v28 = vpack.c.bf16 %v53_v27, %v52_v26  ;;  %v1290_v31 = vpack.c.bf16 %v55_v30, %v54_v29  ;;  %v56_v32 = vld [vmem:[%s1917_s1 + $0x80] sm:$0xff]  ;;  %v57_v33 = vld [vmem:[%s1917_s1 + $0x88] sm:$0xff]  ;;  %v58_v35 = vld [vmem:[%s1917_s1 + $0x90] sm:$0xff] }
   0x9   :  { %1274 = vmatprep.subr.bf16.mxu0 %v1461_v0  ;;  %1307 = vmatpush3.bf16.msra.mxu1 %v1304_v18  ;;  %v1293_v34 = vpack.c.bf16 %v57_v33, %v56_v32  ;;  %v59_v36 = vld [vmem:[%s1917_s1 + $0x98] sm:$0xff]  ;;  %v60_v38 = vld [vmem:[%s1917_s1 + $0xa0] sm:$0xff]  ;;  %v61_v39 = vld [vmem:[%s1917_s1 + $0xa8] sm:$0xff] }
   0xa   :  { %1309 = vmatprep.subr.bf16.mxu1 %v1308_v24  ;;  %v1296_v37 = vpack.c.bf16 %v59_v36, %v58_v35  ;;  %v1299_v40 = vpack.c.bf16 %v61_v39, %v60_v38  ;;  %v62_v41 = vld [vmem:[%s1917_s1 + $0xb0] sm:$0xff]  ;;  %v63_v42 = vld [vmem:[%s1917_s1 + $0xb8] sm:$0xff]  ;;  %v402_v43 = vld [vmem:[%s1920_s7] sm:$0xff] }
   0xb   :  { %v403_v44 = vld [vmem:[%s1920_s7 + $0x8] sm:$0xff]  ;;  %v1302_v45 = vpack.c.bf16 %v63_v42, %v62_v41  ;;  %v404_v47 = vld [vmem:[%s1920_s7 + $0x10] sm:$0xff]  ;;  %v405_v48 = vld [vmem:[%s1920_s7 + $0x18] sm:$0xff] }
   0xc   :  { %1276 = vmatpush1.bf16.msra.mxu0 %v1275_v9  ;;  %v1328_v46 = vpack.c.bf16 %v403_v44, %v402_v43  ;;  %v32_v49 = vld [vmem:[%s1918_s0] sm:$0xff]  ;;  %v35_v50 = vld [vmem:[%s1918_s0 + $0x18] sm:$0xff]  ;;  %v1332_v51 = vpack.c.bf16 %v405_v48, %v404_v47  ;;  %v407_v53 = vld [vmem:[%s1920_s7 + $0x28] sm:$0xff] }
   0xd   :  { %1277 = vmatprep.subr.bf16.mxu0 %v1461_v0  ;;  %1311 = vmatpush3.bf16.msra.mxu1 %v1308_v24  ;;  %v406_v52 = vld [vmem:[%s1920_s7 + $0x20] sm:$0xff]  ;;  %v34_v54 = vld [vmem:[%s1918_s0 + $0x10] sm:$0xff]  ;;  %v37_v55 = vld [vmem:[%s1918_s0 + $0x28] sm:$0xff] }
   0xe   :  { %v1336_v56 = vpack.c.bf16 %v407_v53, %v406_v52  ;;  %v408_v57 = vld [vmem:[%s1920_s7 + $0x30] sm:$0xff]  ;;  %v409_v58 = vld [vmem:[%s1920_s7 + $0x38] sm:$0xff]  ;;  %v36_v59 = vld [vmem:[%s1918_s0 + $0x20] sm:$0xff] }
   0xf   :  { %v39_v60 = vld [vmem:[%s1918_s0 + $0x38] sm:$0xff]  ;;  %v1340_v61 = vpack.c.bf16 %v409_v58, %v408_v57  ;;  %v410_v62 = vld [vmem:[%s1920_s7 + $0x40] sm:$0xff]  ;;  %v411_v63 = vld [vmem:[%s1920_s7 + $0x48] sm:$0xff] }
  0x10   :  { %1279 = vmatpush1.bf16.msra.mxu0 %v1278_v13  ;;  %v1344_v1 = vpack.c.bf16 %v411_v63, %v410_v62  ;;  %v412_v2 = vld [vmem:[%s1920_s7 + $0x50] sm:$0xff]  ;;  %v413_v3 = vld [vmem:[%s1920_s7 + $0x58] sm:$0xff]  ;;  %v181_v5 = vld [vmem:[%s1919_s4 + $0x20] sm:$0xff] }
  0x11   :  { %1280 = vmatprep.subr.bf16.mxu0 %v1461_v0  ;;  %v1348_v4 = vpack.c.bf16 %v413_v3, %v412_v2  ;;  %v182_v6 = vld [vmem:[%s1919_s4 + $0x28] sm:$0xff]  ;;  %v414_v8 = vld [vmem:[%s1920_s7 + $0x60] sm:$0xff]  ;;  %v183_v11 = vld [vmem:[%s1919_s4 + $0x30] sm:$0xff] }
  0x12   :  { %v1312_v7 = vpack.c.bf16 %v182_v6, %v181_v5  ;;  %v415_v9 = vld [vmem:[%s1920_s7 + $0x68] sm:$0xff]  ;;  %v184_v12 = vld [vmem:[%s1919_s4 + $0x38] sm:$0xff]  ;;  %v416_v14 = vld [vmem:[%s1920_s7 + $0x70] sm:$0xff] }
  0x13   :  { %v1352_v10 = vpack.c.bf16 %v415_v9, %v414_v8  ;;  %v1316_v13 = vpack.c.bf16 %v184_v12, %v183_v11  ;;  %v417_v15 = vld [vmem:[%s1920_s7 + $0x78] sm:$0xff]  ;;  %v173_v17 = vld [vmem:[%s1921_s3] sm:$0xff]  ;;  %v174_v18 = vld [vmem:[%s1921_s3 + $0x8] sm:$0xff] }
  0x14   :  { %1282 = vmatpush1.bf16.msra.mxu0 %v1281_v20  ;;  %1313 = vmatprep.subr.bf16.mxu1 %v1312_v7  ;;  %v1356_v16 = vpack.c.bf16 %v417_v15, %v416_v14  ;;  %v175_v19 = vld [vmem:[%s1921_s3 + $0x10] sm:$0xff]  ;;  %v176_v20 = vld [vmem:[%s1921_s3 + $0x18] sm:$0xff]  ;;  %v300_v21 = vld [vmem:[%s1922_s6] sm:$0xff] }
  0x15   :  { %1283 = vmatprep.subr.bf16.mxu0 %v1461_v0  ;;  %1315 = vmatpush3.bf16.msra.mxu1 %v1312_v7  ;;  %v931_v22 = vld [vmem:[%s1923_s2] ss:$0 sm:$0xff]  ;;  %v301_v41 = vld [vmem:[%s1922_s6 + $0x8] sm:$0xff]  ;;  %v302_v42 = vld [vmem:[%s1922_s6 + $0x10] sm:$0xff] }
  0x16   :  { %1317 = vmatprep.subr.bf16.mxu1 %v1316_v13  ;;  %1106 = vmatprep.mubr.msk.f32.mxu1 %vm71_vm0, %v173_v17  ;;  %v303_v43 = vld [vmem:[%s1922_s6 + $0x18] sm:$0xff]  ;;  %v954_v48 = vld [vmem:[%s1920_s7 + $0x80] sm:$0xff]  ;;  %v960_v57 = vld [vmem:[%s1920_s7 + $0xb0] sm:$0xff] }
  0x17   :  { %v957_v52 = vld [vmem:[%s1920_s7 + $0x98] sm:$0xff]  ;;  %v964_v63 = vld [vmem:[%s1920_s7 + $0xd0] sm:$0xff]  ;;  %v946_v6 = vld [vmem:[%s1922_s6 + $0x20] sm:$0xff] }
  0x18   :  { %1285 = vmatpush1.bf16.msra.mxu0 %v1284_v25  ;;  %v961_v58 = vld [vmem:[%s1920_s7 + $0xb8] sm:$0xff]  ;;  %v947_v7 = vld [vmem:[%s1922_s6 + $0x28] sm:$0xff]  ;;  %v948_v8 = vld [vmem:[%s1922_s6 + $0x30] sm:$0xff] }
  0x19   :  { %1286 = vmatprep.subr.bf16.mxu0 %v1461_v0  ;;  %1319 = vmatpush3.bf16.msra.mxu1 %v1316_v13  ;;  %v949_v9 = vld [vmem:[%s1922_s6 + $0x38] sm:$0xff]  ;;  %v971_v11 = vld [vmem:[%s1922_s6 + $0x48] sm:$0xff]  ;;  %v972_v12 = vld [vmem:[%s1922_s6 + $0x50] sm:$0xff] }
  0x1a   :  { %v973_v13 = vld [vmem:[%s1922_s6 + $0x58] sm:$0xff]  ;;  %v966_v14 = vld [vmem:[%s1920_s7 + $0xe0] sm:$0xff]  ;;  %v967_v15 = vld [vmem:[%s1920_s7 + $0xe8] sm:$0xff] }
  0x1b   :  { %v968_v17 = vld [vmem:[%s1920_s7 + $0xf0] sm:$0xff] }
  0x1c   :  { %1288 = vmatpush1.bf16.msra.mxu0 %v1287_v28  ;;  %1107 = vmatmul.mubr.msk.f32.vlgmr.msra.gmra.mrb[0].mxu1 %vm71_vm0, %v174_v18  ;;  %v969_v18 = vld [vmem:[%s1920_s7 + $0xf8] sm:$0xff] }
  0x1d   :  { %1289 = vmatprep.subr.bf16.mxu0 %v1461_v0  ;;  %1109 = vmatprep.mubr.msk.f32.mxu1 %vm71_vm0, %v175_v19  ;;  %v1396_v19 = vpack.c.bf16 %v969_v18, %v968_v17 }
  0x20   :  { %1291 = vmatpush1.bf16.msra.mxu0 %v1290_v31  ;;  %1110 = vmatmul.mubr.msk.f32.gmra.mrb[2].mxu1 %vm71_vm0, %v176_v20  ;;  %v978_v20 = vld [vmem:[%s1920_s7 + $0x100] sm:$0xff] }
  0x21   :  { %1292 = vmatprep.subr.bf16.mxu0 %v1461_v0  ;;  %1120 = vmatprep.mubr.msk.f32.mxu1 %vm304_vm1, %v300_v21  ;;  %v979_v21 = vld [vmem:[%s1920_s7 + $0x108] sm:$0xff] }
  0x24   :  { %1294 = vmatpush1.bf16.msra.mxu0 %v1293_v34 }
  0x25   :  { %1295 = vmatprep.subr.bf16.mxu0 %v1461_v0 }
  0x28   :  { %1297 = vmatpush1.bf16.msra.mxu0 %v1296_v37 }
  0x29   :  { %1298 = vmatprep.subr.bf16.mxu0 %v1461_v0 }
  0x2c   :  { %1300 = vmatpush1.bf16.msra.mxu0 %v1299_v40 }
  0x2d   :  { %1301 = vmatprep.subr.bf16.mxu0 %v1461_v0  ;;  %v38_v0 = vld [vmem:[%s1918_s0 + $0x30] sm:$0xff] }
  0x30   :  { %1303 = vmatpush1.bf16.msra.mxu0 %v1302_v45 }
  0x31   :  { %1329 = vmatprep.subr.bf16.mxu0 %v1328_v46 }
  0x33   :  { %149 = vmatmul.mubr.f32.vlgmr.msra.gmra.mrb[0].mxu0 %v32_v49  ;;  %v955_v49 = vld [vmem:[%s1920_s7 + $0x88] sm:$0xff] }
  0x34   :  { %933 = vmatprep.mubr.msk.f32.mxu0 %vm71_vm0, %v35_v50  ;;  %1331 = vmatpush3.bf16.msra.mxu0 %v1328_v46  ;;  %v956_v50 = vld [vmem:[%s1920_s7 + $0x90] sm:$0xff] }
  0x35   :  { %1333 = vmatprep.subr.bf16.mxu0 %v1332_v51  ;;  %v1372_v53 = vpack.c.bf16 %v957_v52, %v956_v50  ;;  %v985_v52 = vld [vmem:[%s1920_s7 + $0x138] sm:$0xff] }
  0x37   :  { %154 = vmatmul.mubr.f32.gmra.mrb[2].mxu0 %v34_v54  ;;  %v958_v54 = vld [vmem:[%s1920_s7 + $0xa0] sm:$0xff] }
  0x38   :  { %934 = vmatprep.mubr.msk.f32.mxu0 %vm71_vm0, %v37_v55  ;;  %1335 = vmatpush3.bf16.msra.mxu0 %v1332_v51  ;;  %v1368_v51 = vpack.c.bf16 %v955_v49, %v954_v48  ;;  %v959_v55 = vld [vmem:[%s1920_s7 + $0xa8] sm:$0xff] }
  0x39   :  { %1337 = vmatprep.subr.bf16.mxu0 %v1336_v56 }
  0x3b   :  { %159 = vmatmul.mubr.f32.gmra.mrb[4].mxu0 %v36_v59  ;;  %v1380_v59 = vpack.c.bf16 %v961_v58, %v960_v57  ;;  %v987_v57 = vld [vmem:[%s1920_s7 + $0x148] sm:$0xff] }
  0x3c   :  { %935 = vmatprep.mubr.msk.f32.mxu0 %vm71_vm0, %v39_v60  ;;  %1339 = vmatpush3.bf16.msra.mxu0 %v1336_v56  ;;  %v1376_v56 = vpack.c.bf16 %v959_v55, %v958_v54  ;;  %v962_v60 = vld [vmem:[%s1920_s7 + $0xc0] sm:$0xff] }
  0x3d   :  { %1341 = vmatprep.subr.bf16.mxu0 %v1340_v61 }
  0x3f   :  { %164 = vmatmul.mubr.f32.gmra.mrb[6].mxu0 %v38_v0  ;;  %v965_v0 = vld [vmem:[%s1920_s7 + $0xd8] sm:$0xff] }
  0x40   :  { %1343 = vmatpush3.bf16.msra.mxu0 %v1340_v61  ;;  %v963_v61 = vld [vmem:[%s1920_s7 + $0xc8] sm:$0xff] }
  0x41   :  { %1345 = vmatprep.subr.bf16.mxu0 %v1344_v1  ;;  %v1384_v62 = vpack.c.bf16 %v963_v61, %v962_v60  ;;  %v988_v61 = vld [vmem:[%s1920_s7 + $0x150] sm:$0xff] }
  0x44   :  { %1347 = vmatpush3.bf16.msra.mxu0 %v1344_v1  ;;  %v1388_v1 = vpack.c.bf16 %v965_v0, %v964_v63  ;;  %v990_v0 = vld [vmem:[%s1920_s7 + $0x160] sm:$0xff] }
  0x45   :  { %1349 = vmatprep.subr.bf16.mxu0 %v1348_v4 }
  0x48   :  { %1351 = vmatpush3.bf16.msra.mxu0 %v1348_v4 }
  0x49   :  { %1353 = vmatprep.subr.bf16.mxu0 %v1352_v10 }
  0x4c   :  { %1355 = vmatpush3.bf16.msra.mxu0 %v1352_v10  ;;  %v970_v10 = vld [vmem:[%s1922_s6 + $0x40] sm:$0xff] }
  0x4d   :  { %1357 = vmatprep.subr.bf16.mxu0 %v1356_v16 }
  0x50   :  { %1359 = vmatpush3.bf16.msra.mxu0 %v1356_v16  ;;  %v1392_v16 = vpack.c.bf16 %v967_v15, %v966_v14 }
  0xef   :  { %v1740_v44 = vpop.f32.mrb[0].mxu1 }
  0xf0   :  { %v1742_v45 = vpop.f32.mrb[1].mxu1 }
  0xf3   :  { %v1744_v46 = vpop.f32.mrb[2].mxu1 }
  0xf4   :  { %v1746_v47 = vpop.f32.mrb[3].mxu1 }
 0x106   :  { %v150_v23 = vpop.f32.mrb[0].mxu0 }
 0x107   :  { %v152_v24 = vpop.f32.mrb[1].mxu0  ;;  %v151_v25 = vadd.f32 %v931_v22, %v150_v23  ;;  %v936_v23 = vld [vmem:[%s1924_s5] ss:$0 sm:$0xff] }
 0x108   :  { %v276_v24 = vadd.f32 %v1740_v44, %v936_v23 }
 0x109   :  { %v169_v29 = vmax.f32 %v151_v25, 0.0  ;;  %v271_v25 = vadd.f32 %v936_v23, %v1742_v45 }
 0x10a   :  { %v155_v26 = vpop.f32.mrb[2].mxu0 }
 0x10b   :  { %v156_v27 = vadd.f32 %v931_v22, %v155_v26  ;;  %v157_v28 = vpop.f32.mrb[3].mxu0  ;;  %v941_v26 = vld [vmem:[%s1925_s8] ss:$0 sm:$0xff] }
 0x10c   :  { %v297_v28 = vadd.f32 %v941_v26, %v276_v24 }
 0x10d   :  { %v170_v30 = vmax.f32 %v156_v27, 0.0  ;;  %v286_v27 = vadd.f32 %v1744_v46, %v936_v23  ;;  %v982_v46 = vld [vmem:[%s1920_s7 + $0x120] sm:$0xff] }
 0x10e   :  { %v160_v31 = vpop.f32.mrb[4].mxu0 }
 0x10f   :  { %v1719_v32 = vpack.c.bf16 %v170_v30, %v169_v29  ;;  %v162_v33 = vpop.f32.mrb[5].mxu0  ;;  %v161_v34 = vadd.f32 %v931_v22, %v160_v31  ;;  %v281_v29 = vadd.f32 %v936_v23, %v1746_v47  ;;  %v296_v31 = vadd.f32 %v941_v26, %v271_v25  ;;  %v983_v47 = vld [vmem:[%s1920_s7 + $0x128] sm:$0xff] }
 0x110   :  { %v1416_v49 = vpack.c.bf16 %v983_v47, %v982_v46 }
 0x111   :  { %1321 = vmatprep.subr.bf16.mxu1 %v1719_v32  ;;  %1361 = vmatprep.subr.bf16.mxu0 %v1719_v32  ;;  %v171_v38 = vmax.f32 %v161_v34, 0.0 }
 0x112   :  { %v165_v35 = vpop.f32.mrb[6].mxu0  ;;  %1323 = vmatpush3.bf16.msra.mxu1 %v1719_v32 }
 0x113   :  { %v166_v36 = vadd.f32 %v931_v22, %v165_v35  ;;  %v167_v37 = vpop.f32.mrb[7].mxu0  ;;  %v1408_v22 = vpack.c.bf16 %v979_v21, %v978_v20  ;;  %v299_v35 = vadd.f32 %v941_v26, %v286_v27 }
 0x114   :  { %v298_v37 = vadd.f32 %v941_v26, %v281_v29 }
 0x115   :  { %v172_v39 = vmax.f32 %v166_v36, 0.0 }
 0x117   :  { %v1724_v40 = vpack.c.bf16 %v172_v39, %v171_v38 }
 0x119   :  { %1325 = vmatprep.subr.bf16.mxu1 %v1724_v40 }
 0x11a   :  { %1327 = vmatpush3.bf16.msra.mxu1 %v1724_v40 }
 0x11b   :  { %1369 = vmatprep.subr.bf16.mxu1 %v1368_v51 }
 0x11d   :  { %1121 = vmatmul.mubr.msk.f32.vlgmr.msra.gmra.mrb[4].mxu1 %vm304_vm1, %v301_v41  ;;  %v980_v41 = vld [vmem:[%s1920_s7 + $0x110] sm:$0xff] }
 0x11e   :  { %1123 = vmatprep.mubr.msk.f32.mxu1 %vm304_vm1, %v302_v42  ;;  %1371 = vmatpush3.bf16.msra.mxu1 %v1368_v51  ;;  %v981_v42 = vld [vmem:[%s1920_s7 + $0x118] sm:$0xff]  ;;  %v984_v51 = vld [vmem:[%s1920_s7 + $0x130] sm:$0xff] }
 0x11f   :  { %1373 = vmatprep.subr.bf16.mxu1 %v1372_v53  ;;  %v1412_v45 = vpack.c.bf16 %v981_v42, %v980_v41  ;;  %v1420_v54 = vpack.c.bf16 %v985_v52, %v984_v51 }
 0x121   :  { %1124 = vmatmul.mubr.msk.f32.gmra.mrb[6].mxu1 %vm304_vm1, %v303_v43 }
 0x122   :  { %1375 = vmatpush3.bf16.msra.mxu1 %v1372_v53 }
 0x123   :  { %1377 = vmatprep.subr.bf16.mxu1 %v1376_v56 }
 0x126   :  { %1379 = vmatpush3.bf16.msra.mxu1 %v1376_v56  ;;  %v986_v56 = vld [vmem:[%s1920_s7 + $0x140] sm:$0xff] }
 0x127   :  { %1381 = vmatprep.subr.bf16.mxu1 %v1380_v59 }
 0x12a   :  { %1383 = vmatpush3.bf16.msra.mxu1 %v1380_v59  ;;  %v1424_v59 = vpack.c.bf16 %v987_v57, %v986_v56 }
 0x12b   :  { %1385 = vmatprep.subr.bf16.mxu1 %v1384_v62 }
 0x12e   :  { %1387 = vmatpush3.bf16.msra.mxu1 %v1384_v62  ;;  %v989_v62 = vld [vmem:[%s1920_s7 + $0x158] sm:$0xff] }
 0x12f   :  { %1389 = vmatprep.subr.bf16.mxu1 %v1388_v1  ;;  %v1428_v63 = vpack.c.bf16 %v989_v62, %v988_v61 }
 0x132   :  { %1391 = vmatpush3.bf16.msra.mxu1 %v1388_v1  ;;  %v991_v1 = vld [vmem:[%s1920_s7 + $0x168] sm:$0xff] }
 0x133   :  { %1393 = vmatprep.subr.bf16.mxu1 %v1392_v16 }
 0x136   :  { %1395 = vmatpush3.bf16.msra.mxu1 %v1392_v16 }
 0x137   :  { %1397 = vmatprep.subr.bf16.mxu1 %v1396_v19 }
 0x13a   :  { %1399 = vmatpush3.bf16.msra.mxu1 %v1396_v19 }
 0x13b   :  { %1409 = vmatprep.subr.bf16.mxu1 %v1408_v22 }
 0x1f0   :  { %v1122_v2 = vpop.f32.mrb[4].mxu1 }
 0x1f1   :  { %v383_v3 = vpop.f32.mrb[5].mxu1 }
 0x1f2   :  { %1158 = vmatprep.mubr.f32.mxu0 %v383_v3  ;;  %v992_v3 = vld [vmem:[%s1920_s7 + $0x170] sm:$0xff] }
 0x1f3   :  { %1159 = vmatmul.mubr.f32.vlgmr.msra.gmra.mrb[8].mxu0 %v1122_v2  ;;  %v1432_v2 = vpack.c.bf16 %v991_v1, %v990_v0 }
 0x1f4   :  { %1363 = vmatpush3.bf16.msra.mxu0 %v1719_v32  ;;  %v1125_v4 = vpop.f32.mrb[6].mxu1 }
 0x1f5   :  { %1365 = vmatprep.subr.bf16.mxu0 %v1724_v40  ;;  %v393_v5 = vpop.f32.mrb[7].mxu1 }
 0x1f6   :  { %1161 = vmatprep.mubr.f32.mxu0 %v393_v5 }
 0x1f7   :  { %1162 = vmatmul.mubr.f32.gmra.mrb[10].mxu0 %v1125_v4  ;;  %v993_v4 = vld [vmem:[%s1920_s7 + $0x178] sm:$0xff] }
 0x1f8   :  { %1367 = vmatpush3.bf16.msra.mxu0 %v1724_v40  ;;  %1172 = vmatprep.mubr.msk.f32.mxu0 %vm304_vm1, %v946_v6  ;;  %v1436_v5 = vpack.c.bf16 %v993_v4, %v992_v3 }
 0x1f9   :  { %1401 = vmatprep.subr.bf16.mxu0 %v1719_v32 }
 0x1fb   :  { %1173 = vmatmul.mubr.msk.f32.vlgmr.msra.gmra.mrb[12].mxu0 %vm304_vm1, %v947_v7 }
 0x1fc   :  { %1403 = vmatpush3.bf16.msra.mxu0 %v1719_v32  ;;  %1175 = vmatprep.mubr.msk.f32.mxu0 %vm304_vm1, %v948_v8 }
 0x1fd   :  { %1405 = vmatprep.subr.bf16.mxu0 %v1724_v40 }
 0x1ff   :  { %1176 = vmatmul.mubr.msk.f32.gmra.mrb[14].mxu0 %vm304_vm1, %v949_v9 }
 0x200   :  { %1407 = vmatpush3.bf16.msra.mxu0 %v1724_v40  ;;  %1224 = vmatprep.mubr.msk.f32.mxu0 %vm304_vm1, %v970_v10 }
 0x203   :  { %1225 = vmatmul.mubr.msk.f32.vlgmr.msra.gmra.mrb[16].mxu0 %vm304_vm1, %v971_v11 }
 0x204   :  { %1227 = vmatprep.mubr.msk.f32.mxu0 %vm304_vm1, %v972_v12 }
 0x207   :  { %1228 = vmatmul.mubr.msk.f32.gmra.mrb[18].mxu0 %vm304_vm1, %v973_v13 }
 0x2c6   :  { %v1160_v30 = vpop.f32.mrb[8].mxu0 }
 0x2c7   :  { %v1851_v32 = vadd.f32 %v1160_v30, %v297_v28  ;;  %v484_v33 = vpop.f32.mrb[9].mxu0 }
 0x2c8   :  { %v1853_v34 = vadd.f32 %v484_v33, %v296_v31 }
 0x2ca   :  { %v1163_v36 = vpop.f32.mrb[10].mxu0 }
 0x2cb   :  { %v1855_v38 = vadd.f32 %v1163_v36, %v299_v35  ;;  %v494_v39 = vpop.f32.mrb[11].mxu0 }
 0x2cc   :  { %v1857_v40 = vadd.f32 %v494_v39, %v298_v37 }
 0x2ce   :  { %v1174_v43 = vpop.f32.mrb[12].mxu0 }
 0x2cf   :  { %v590_v44 = vpop.f32.mrb[13].mxu0 }
 0x2d0   :  { %1210 = vmatprep.mubr.f32.mxu1 %v590_v44 }
 0x2d1   :  { %1211 = vmatmul.mubr.f32.vlgmr.msra.gmra.mrb[8].mxu1 %v1174_v43 }
 0x2d2   :  { %1411 = vmatpush3.bf16.msra.mxu1 %v1408_v22  ;;  %v1177_v48 = vpop.f32.mrb[14].mxu0 }
 0x2d3   :  { %1413 = vmatprep.subr.bf16.mxu1 %v1412_v45  ;;  %v600_v50 = vpop.f32.mrb[15].mxu0 }
 0x2d4   :  { %1213 = vmatprep.mubr.f32.mxu1 %v600_v50 }
 0x2d5   :  { %1214 = vmatmul.mubr.f32.gmra.mrb[10].mxu1 %v1177_v48 }
 0x2d6   :  { %1415 = vmatpush3.bf16.msra.mxu1 %v1412_v45  ;;  %v1226_v53 = vpop.f32.mrb[16].mxu0 }
 0x2d7   :  { %1417 = vmatprep.subr.bf16.mxu1 %v1416_v49  ;;  %v798_v55 = vpop.f32.mrb[17].mxu0 }
 0x2d8   :  { %1262 = vmatprep.mubr.f32.mxu1 %v798_v55 }
 0x2da   :  { %1419 = vmatpush3.bf16.msra.mxu1 %v1416_v49  ;;  %v1229_v58 = vpop.f32.mrb[18].mxu0 }
 0x2db   :  { %1421 = vmatprep.subr.bf16.mxu1 %v1420_v54  ;;  %v808_v60 = vpop.f32.mrb[19].mxu0 }
 0x2de   :  { %1423 = vmatpush3.bf16.msra.mxu1 %v1420_v54 }
 0x2df   :  { %1425 = vmatprep.subr.bf16.mxu1 %v1424_v59 }
 0x2e2   :  { %1427 = vmatpush3.bf16.msra.mxu1 %v1424_v59 }
 0x2e3   :  { %1429 = vmatprep.subr.bf16.mxu1 %v1428_v63 }
 0x2e6   :  { %1431 = vmatpush3.bf16.msra.mxu1 %v1428_v63 }
 0x2e7   :  { %1433 = vmatprep.subr.bf16.mxu1 %v1432_v2 }
 0x2ea   :  { %1435 = vmatpush3.bf16.msra.mxu1 %v1432_v2 }
 0x2eb   :  { %1437 = vmatprep.subr.bf16.mxu1 %v1436_v5 }
 0x2ee   :  { %1439 = vmatpush3.bf16.msra.mxu1 %v1436_v5 }
 0x2f1   :  { %1263 = vmatmul.mubr.f32.vlgmr.msra.gmra.mrb[8].mxu1 %v1226_v53 }
 0x2f2   :  { %1265 = vmatprep.mubr.f32.mxu1 %v808_v60 }
 0x2f5   :  { %1266 = vmatmul.mubr.f32.gmra.mrb[10].mxu1 %v1229_v58 }
 0x3c4   :  { %v1264_v6 = vpop.f32.mrb[8].mxu1 }
 0x3c5   :  { %v1443_v7 = vadd.f32 %v1264_v6, %v1851_v32  ;;  %v900_v8 = vpop.f32.mrb[9].mxu1 }
 0x3c6   :  { %v1447_v9 = vadd.f32 %v900_v8, %v1853_v34 }
 0x3c7   :  { %924 = vst [vmem:[%s1926_s9 + $0x8] sm:$0xff] %v1443_v7 }
 0x3c8   :  { %923 = vst [vmem:[%s1926_s9] sm:$0xff] %v1447_v9  ;;  %v1267_v10 = vpop.f32.mrb[10].mxu1 }
 0x3c9   :  { %v1451_v11 = vadd.f32 %v1267_v10, %v1855_v38  ;;  %v910_v12 = vpop.f32.mrb[11].mxu1 }
 0x3ca   :  { %v1455_v13 = vadd.f32 %v910_v12, %v1857_v40 }
 0x3cb   :  { %926 = vst [vmem:[%s1926_s9 + $0x18] sm:$0xff] %v1451_v11 }
 0x3cc   :  { %925 = vst [vmem:[%s1926_s9 + $0x10] sm:$0xff] %v1455_v13 }

</bundles_post_ra>
